<compile_context>
chip_gen: v7x
topology: tpu7x:2x2x1
jax: 0.10.0
libtpu: 0.0.40
codegen_flags: <defaults>
</compile_context>

<pallas_src>
import functools

import jax
import jax.numpy as jnp
from jax import lax
from jax.experimental import pallas as pl
from jax.experimental.pallas import tpu as pltpu


def _round_up(x, m):
    return ((x + m - 1) // m) * m


# --------------------------------------------------------------------------- #
# Pass A: DMA-gather image rows, batched bf16 Linear on the MXU, BN partial stats.
# --------------------------------------------------------------------------- #
def _project_bn_stats_kernel(s_ref, o_ref,            # prefetched indices (SMEM)
                             img_hbm,                  # image_emb table (HBM, pl.ANY)
                             w_ref, b_ref,             # Linear params (VMEM resident)
                             proj_s_ref, proj_o_ref,   # (TB, emb) projection tiles
                             stats_ref,                # (8, emb) per-tile partial stats
                             img_buf, sem,             # scratch: staging + DMA sems
                             *, tb, batch, emb_dim):
    t = pl.program_id(0)
    start = t * tb

    # Issue all 2*TB single-row gathers (s rows -> [0, TB), o rows -> [TB, 2*TB)).
    def _issue(j, carry):
        pltpu.make_async_copy(img_hbm.at[s_ref[start + j]], img_buf.at[j], sem.at[0]).start()
        pltpu.make_async_copy(img_hbm.at[o_ref[start + j]], img_buf.at[tb + j], sem.at[1]).start()
        return carry
    lax.fori_loop(0, tb, _issue, 0)

    def _wait(j, carry):
        pltpu.make_async_copy(img_hbm.at[0], img_buf.at[j], sem.at[0]).wait()
        pltpu.make_async_copy(img_hbm.at[0], img_buf.at[tb + j], sem.at[1]).wait()
        return carry
    lax.fori_loop(0, tb, _wait, 0)

    f32 = jnp.float32
    # One batched bf16 matmul per tile (MXU), f32 accumulation.
    lhs = img_buf[...].astype(jnp.bfloat16)                      # (2*TB, img_dim)
    proj = jnp.dot(lhs, w_ref[...], preferred_element_type=f32) + b_ref[...]
    proj_s = proj[:tb, :]
    proj_o = proj[tb:, :]
    proj_s_ref[...] = proj_s
    proj_o_ref[...] = proj_o

    # Per-tile partial BN statistics (rows: sum_s, sumsq_s, sum_o, sumsq_o, 4x pad),
    # with padded batch rows masked out.  Disjoint per tile => grid stays "parallel".
    rows = start + lax.broadcasted_iota(jnp.int32, (tb, 1), 0)
    valid = (rows < batch).astype(f32)
    ps = proj_s * valid
    po = proj_o * valid
    stats_ref[...] = jnp.concatenate(
        [jnp.sum(ps, axis=0, keepdims=True),
         jnp.sum(ps * proj_s, axis=0, keepdims=True),
         jnp.sum(po, axis=0, keepdims=True),
         jnp.sum(po * proj_o, axis=0, keepdims=True),
         jnp.zeros((4, emb_dim), f32)], axis=0)


# --------------------------------------------------------------------------- #
# Pass B: DMA-gather fused entity rows, BN scale/shift, score (dense tiled output).
# --------------------------------------------------------------------------- #
def _score_kernel(s_ref, o_ref,                        # prefetched indices (SMEM)
                  ent_hbm,                              # fused [E_base | E_t] (HBM, pl.ANY)
                  rel_ref,                              # (TB, base+2*emb) relation rows
                  proj_s_ref, proj_o_ref,               # (TB, emb) projections
                  bn_ref,                               # (4, emb) folded BN scale/shift
                  out_ref,                              # (TB, 128) dense score tile
                  ent_buf, sem,                         # scratch: staging + DMA sems
                  *, tb, base_dim, emb_dim, psi, mult):
    t = pl.program_id(0)
    start = t * tb

    def _issue(j, carry):
        pltpu.make_async_copy(ent_hbm.at[s_ref[start + j]], ent_buf.at[j], sem.at[0]).start()
        pltpu.make_async_copy(ent_hbm.at[o_ref[start + j]], ent_buf.at[tb + j], sem.at[1]).start()
        return carry
    lax.fori_loop(0, tb, _issue, 0)

    def _wait(j, carry):
        pltpu.make_async_copy(ent_hbm.at[0], ent_buf.at[j], sem.at[0]).wait()
        pltpu.make_async_copy(ent_hbm.at[0], ent_buf.at[tb + j], sem.at[1]).wait()
        return carry
    lax.fori_loop(0, tb, _wait, 0)

    ent = ent_buf[...]                                   # (2*TB, base+emb) f32
    eb_s = ent[:tb, :base_dim]
    et_s = ent[:tb, base_dim:]
    eb_o = ent[tb:, :base_dim]
    et_o = ent[tb:, base_dim:]

    rel = rel_ref[...]                                   # (TB, base+2*emb) f32
    rb = rel[:, :base_dim]
    rht = rel[:, base_dim:base_dim + emb_dim]
    rtt = rel[:, base_dim + emb_dim:]

    # Folded training-mode BatchNorm: x * scale + shift.
    s_img = proj_s_ref[...] * bn_ref[0:1, :] + bn_ref[1:2, :]
    o_img = proj_o_ref[...] * bn_ref[2:3, :] + bn_ref[3:4, :]

    def rsum(x):                                         # per-row lane reduction (XLU)
        return jnp.sum(x, axis=-1, keepdims=True)

    def sig(x):                                          # exp on the EUP
        return 1.0 / (1.0 + jnp.exp(-psi * x))

    base = sig(rsum(eb_s * rb * eb_o))
    head_tc = sig(rsum(et_s * rht))
    tail_tc = sig(rsum(et_o * rtt))
    image_head = rsum(s_img * rht * et_s)
    image_tail = rsum(o_img * rtt * et_o)
    image_image = rsum(s_img * o_img)

    score = mult * (base * head_tc * tail_tc
                    + 0.005 * (image_head + image_tail + image_image))   # (TB, 1)
    # Dense, unmasked, per-tile-disjoint store; wrapper reads lane 0.
    out_ref[...] = jnp.broadcast_to(score, out_ref.shape)


# --------------------------------------------------------------------------- #
# Forward wrapper.
# --------------------------------------------------------------------------- #
def typed_image_model_reg_forward(params, s, r, o, *, psi=1.0, mult=20.0,
                                  eps=1e-5, tb_max=256, interpret=False):
    f32 = jnp.float32
    s_idx = jnp.asarray(s).reshape(-1).astype(jnp.int32)
    r_idx = jnp.asarray(r).reshape(-1).astype(jnp.int32)
    o_idx = jnp.asarray(o).reshape(-1).astype(jnp.int32)
    batch = int(s_idx.shape[0])

    emb_dim = int(params["E_t"].shape[1])
    base_dim = int(params["E_base"].shape[1])
    img_dim = int(params["image_emb"].shape[1])

    # Batch tile: 256 fills the v6e/v7x 256-wide MXU (v5e fills at 128 and is still
    # fine with 256).  Shrunk for tiny batches so the demo does no wasted work.
    tb = min(int(tb_max), _round_up(batch, 8))
    b_pad = _round_up(batch, tb)
    num_tiles = b_pad // tb
    pad = b_pad - batch

    s_pad = jnp.pad(s_idx, (0, pad))                    # pad with valid index 0
    o_pad = jnp.pad(o_idx, (0, pad))
    r_pad = jnp.pad(r_idx, (0, pad))

    # Fused entity table [E_base | E_t]: one gather DMA per row instead of two.
    ent_fused = jnp.concatenate(
        [params["E_base"].astype(f32), params["E_t"].astype(f32)], axis=-1)
    ent_width = base_dim + emb_dim

    # Relation rows gathered once in the wrapper (tiny tables; removes 3 per-row DMAs).
    # TODO(synk): alternatively keep the fused relation table VMEM-resident and index it
    #             in-kernel with the prefetched r.
    rel_rows = jnp.concatenate(
        [params["R_base"].astype(f32)[r_pad],
         params["R_ht"].astype(f32)[r_pad],
         params["R_tt"].astype(f32)[r_pad]], axis=-1)   # (b_pad, base+2*emb)
    rel_width = base_dim + 2 * emb_dim

    image_emb = params["image_emb"].astype(f32)
    w_t = params["W"].astype(jnp.bfloat16).T            # (img_dim, emb_dim) bf16 for MXU
    b_lin = params["b_lin"].astype(f32).reshape(1, emb_dim)

    cparams = pltpu.CompilerParams(
        dimension_semantics=("parallel",),               # outputs disjoint per tile
        vmem_limit_bytes=32 * 1024 * 1024)

    # ---------------- Pass A ----------------
    grid_a = pltpu.PrefetchScalarGridSpec(
        num_scalar_prefetch=2,
        grid=(num_tiles,),
        in_specs=[
            pl.BlockSpec(memory_space=pl.ANY),                             # image_emb (HBM)
            pl.BlockSpec((img_dim, emb_dim), lambda t, si, oi: (0, 0)),    # W^T (resident)
            pl.BlockSpec((1, emb_dim), lambda t, si, oi: (0, 0)),          # bias (resident)
        ],
        out_specs=[
            pl.BlockSpec((tb, emb_dim), lambda t, si, oi: (t, 0)),         # proj_s
            pl.BlockSpec((tb, emb_dim), lambda t, si, oi: (t, 0)),         # proj_o
            pl.BlockSpec((8, emb_dim), lambda t, si, oi: (t, 0)),          # partial BN stats
        ],
        scratch_shapes=[
            pltpu.VMEM((2 * tb, img_dim), jnp.float32),                    # gather staging
            pltpu.SemaphoreType.DMA((2,)),
        ],
    )
    proj_s, proj_o, stats = pl.pallas_call(
        functools.partial(_project_bn_stats_kernel, tb=tb, batch=batch, emb_dim=emb_dim),
        grid_spec=grid_a,
        out_shape=(
            jax.ShapeDtypeStruct((b_pad, emb_dim), jnp.float32),
            jax.ShapeDtypeStruct((b_pad, emb_dim), jnp.float32),
            jax.ShapeDtypeStruct((num_tiles * 8, emb_dim), jnp.float32),
        ),
        compiler_params=cparams,
        interpret=interpret,
    )(s_pad, o_pad, image_emb, w_t, b_lin)

    # Reduce per-tile partials and fold BN into scale/shift (tiny, done in JAX).
    stats = stats.reshape(num_tiles, 8, emb_dim)[:, :4, :].sum(axis=0)     # (4, emb)
    inv_b = 1.0 / float(batch)
    mean_s = stats[0] * inv_b
    var_s = jnp.maximum(stats[1] * inv_b - mean_s * mean_s, 0.0)           # biased variance
    mean_o = stats[2] * inv_b
    var_o = jnp.maximum(stats[3] * inv_b - mean_o * mean_o, 0.0)
    gamma = params["gamma"].astype(f32)
    beta = params["beta"].astype(f32)
    scale_s = gamma * lax.rsqrt(var_s + eps)
    scale_o = gamma * lax.rsqrt(var_o + eps)
    bn_mat = jnp.stack([scale_s, beta - mean_s * scale_s,
                        scale_o, beta - mean_o * scale_o], axis=0)         # (4, emb)

    # ---------------- Pass B ----------------
    grid_b = pltpu.PrefetchScalarGridSpec(
        num_scalar_prefetch=2,
        grid=(num_tiles,),
        in_specs=[
            pl.BlockSpec(memory_space=pl.ANY),                             # [E_base|E_t] (HBM)
            pl.BlockSpec((tb, rel_width), lambda t, si, oi: (t, 0)),       # relation rows
            pl.BlockSpec((tb, emb_dim), lambda t, si, oi: (t, 0)),         # proj_s
            pl.BlockSpec((tb, emb_dim), lambda t, si, oi: (t, 0)),         # proj_o
            pl.BlockSpec((4, emb_dim), lambda t, si, oi: (0, 0)),          # BN scale/shift
        ],
        out_specs=pl.BlockSpec((tb, 128), lambda t, si, oi: (t, 0)),
        scratch_shapes=[
            pltpu.VMEM((2 * tb, ent_width), jnp.float32),                  # gather staging
            pltpu.SemaphoreType.DMA((2,)),
        ],
    )
    scores = pl.pallas_call(
        functools.partial(_score_kernel, tb=tb, base_dim=base_dim, emb_dim=emb_dim,
                          psi=float(psi), mult=float(mult)),
        grid_spec=grid_b,
        out_shape=jax.ShapeDtypeStruct((b_pad, 128), jnp.float32),
        compiler_params=cparams,
        interpret=interpret,
    )(s_pad, o_pad, ent_fused, rel_rows, proj_s, proj_o, bn_mat)

    return scores[:batch, 0:1]


# --------------------------------------------------------------------------- #
# Pure-JAX reference (same semantics) for validation.
# --------------------------------------------------------------------------- #
def typed_image_model_reg_reference(params, s, r, o, *, psi=1.0, mult=20.0, eps=1e-5):
    f32 = jnp.float32
    s_idx = jnp.asarray(s).reshape(-1)
    r_idx = jnp.asarray(r).reshape(-1)
    o_idx = jnp.asarray(o).reshape(-1)

    e_b = params["E_base"].astype(f32)
    r_b = params["R_base"].astype(f32)
    e_t = params["E_t"].astype(f32)
    r_ht = params["R_ht"].astype(f32)
    r_tt = params["R_tt"].astype(f32)
    img = params["image_emb"].astype(f32)
    w_t = params["W"].astype(f32).T
    b_lin = params["b_lin"].astype(f32)
    gamma = params["gamma"].astype(f32)
    beta = params["beta"].astype(f32)

    base = jnp.sum(e_b[s_idx] * r_b[r_idx] * e_b[o_idx], axis=-1)
    et_s, et_o = e_t[s_idx], e_t[o_idx]
    rht, rtt = r_ht[r_idx], r_tt[r_idx]

    def bn(x):
        m = jnp.mean(x, axis=0)
        v = jnp.mean(x * x, axis=0) - m * m              # biased (training-mode) variance
        return (x - m) * lax.rsqrt(v + eps) * gamma + beta

    s_img = bn(img[s_idx] @ w_t + b_lin)
    o_img = bn(img[o_idx] @ w_t + b_lin)

    sig = lambda v: 1.0 / (1.0 + jnp.exp(-psi * v))
    head_tc = jnp.sum(et_s * rht, axis=-1)
    tail_tc = jnp.sum(et_o * rtt, axis=-1)
    image_head = jnp.sum(s_img * rht * et_s, axis=-1)
    image_tail = jnp.sum(o_img * rtt * et_o, axis=-1)
    image_image = jnp.sum(s_img * o_img, axis=-1)

    out = mult * (sig(base) * sig(head_tc) * sig(tail_tc)
                  + 0.005 * (image_head + image_tail + image_image))
    return out.reshape(-1, 1)


# --------------------------------------------------------------------------- #
if __name__ == "__main__":
    key = jax.random.PRNGKey(0)
    n_ent, n_rel = 64, 16
    emb_dim = 128          # type / base embedding dim
    img_dim = 256          # image embedding dim
    batch = 8

    ks = jax.random.split(key, 12)
    params = dict(
        E_base=(jax.random.normal(ks[0], (n_ent, emb_dim)) * 0.05).astype(jnp.float32),
        R_base=(jax.random.normal(ks[1], (n_rel, emb_dim)) * 0.05).astype(jnp.float32),
        E_t=(jax.random.normal(ks[2], (n_ent, emb_dim)) * 0.05).astype(jnp.float32),
        R_ht=(jax.random.normal(ks[3], (n_rel, emb_dim)) * 0.05).astype(jnp.float32),
        R_tt=(jax.random.normal(ks[4], (n_rel, emb_dim)) * 0.05).astype(jnp.float32),
        image_emb=jax.random.uniform(ks[5], (n_ent, img_dim)).astype(jnp.float32),
        W=(jax.random.normal(ks[6], (emb_dim, img_dim)) * 0.05).astype(jnp.float32),
        b_lin=jax.random.uniform(ks[7], (emb_dim,), minval=-0.05, maxval=0.05).astype(jnp.float32),
        gamma=jnp.ones((emb_dim,), jnp.float32),
        beta=jnp.zeros((emb_dim,), jnp.float32),
    )
    s = jax.random.randint(ks[8], (batch, 1), 0, n_ent, dtype=jnp.int32)
    r = jax.random.randint(ks[9], (batch, 1), 0, n_rel, dtype=jnp.int32)
    o = jax.random.randint(ks[10], (batch, 1), 0, n_ent, dtype=jnp.int32)

    out = jax.block_until_ready(typed_image_model_reg_forward(params, s, r, o))
    ref = jax.block_until_ready(typed_image_model_reg_reference(params, s, r, o))

    assert out.shape == (batch, 1), out.shape
    max_err = float(jnp.max(jnp.abs(out - ref)))
    # bf16 MXU matmul (W, image rows) vs. f32 reference: small relative error expected.
    assert max_err < 5e-2, f"max abs error vs reference: {max_err}"
    print("KERNEL_OK")
</pallas_src>

<mosaic_0001>
module attributes {stable_mosaic.version = 11 : i64} {
  func.func @_project_bn_stats_kernel(%arg0: i32, %arg1: memref<8xi32, #tpu.memory_space<smem>>, %arg2: memref<8xi32, #tpu.memory_space<smem>>, %arg3: memref<64x256xf32, #tpu.memory_space<any>>, %arg4: memref<256x128xbf16, #tpu.memory_space<vmem>>, %arg5: memref<1x128xf32, #tpu.memory_space<vmem>>, %arg6: memref<8x128xf32, #tpu.memory_space<vmem>>, %arg7: memref<8x128xf32, #tpu.memory_space<vmem>>, %arg8: memref<8x128xf32, #tpu.memory_space<vmem>>, %arg9: memref<16x256xf32, #tpu.memory_space<vmem>>, %arg10: memref<2x!tpu.dma_semaphore, #tpu.memory_space<semaphore_mem>>) attributes {dimension_semantics = [#tpu.dimension_semantics<parallel>], iteration_bounds = array<i64: 1>, scalar_prefetch = 2 : i64, scratch_operands = 2 : i64, tpu.core_type = #tpu.core_type<tc>, window_params = [{}, {pipeline_mode = #tpu.pipeline_mode<synchronous>, transform_indices = @transform_1, window_bounds = array<i64: 256, 128>}, {pipeline_mode = #tpu.pipeline_mode<synchronous>, transform_indices = @transform_2, window_bounds = array<i64: 1, 128>}, {transform_indices = @transform_3, window_bounds = array<i64: 8, 128>}, {transform_indices = @transform_4, window_bounds = array<i64: 8, 128>}, {transform_indices = @transform_5, window_bounds = array<i64: 8, 128>}]} {
    %c8_i32 = arith.constant 8 : i32
    %0 = arith.muli %arg0, %c8_i32 : i32
    %c0_i32 = arith.constant 0 : i32
    %c8_i32_0 = arith.constant 8 : i32
    %1 = arith.addi %c0_i32, %c8_i32_0 : i32
    %c1_i32 = arith.constant 1 : i32
    scf.for %arg11 = %c0_i32 to %1 step %c1_i32  : i32 {
      %38 = arith.addi %0, %arg11 : i32
      %39 = arith.index_cast %38 : i32 to index
      %40 = memref.load %arg1[%39] : memref<8xi32, #tpu.memory_space<smem>>
      %c0_i32_23 = arith.constant 0 : i32
      %c0_i32_24 = arith.constant 0 : i32
      %41 = tpu.memref_slice %arg3[%40, %c0_i32_24] : memref<64x256xf32, #tpu.memory_space<any>> -> memref<1x256xf32, #tpu.memory_space<any>>
      %42 = tpu.memref_squeeze %41 : memref<1x256xf32, #tpu.memory_space<any>> -> memref<256xf32, #tpu.memory_space<any>>
      %c0_i32_25 = arith.constant 0 : i32
      %43 = tpu.memref_slice %arg9[%arg11, %c0_i32_25] : memref<16x256xf32, #tpu.memory_space<vmem>> -> memref<1x256xf32, #tpu.memory_space<vmem>>
      %44 = tpu.memref_squeeze %43 : memref<1x256xf32, #tpu.memory_space<vmem>> -> memref<256xf32, #tpu.memory_space<vmem>>
      %45 = tpu.memref_slice %arg10[%c0_i32_23] : memref<2x!tpu.dma_semaphore, #tpu.memory_space<semaphore_mem>> -> memref<1x!tpu.dma_semaphore, #tpu.memory_space<semaphore_mem>>
      %46 = tpu.memref_squeeze %45 : memref<1x!tpu.dma_semaphore, #tpu.memory_space<semaphore_mem>> -> memref<!tpu.dma_semaphore, #tpu.memory_space<semaphore_mem>>
      tpu.enqueue_dma source(%42 : memref<256xf32, #tpu.memory_space<any>>) target(%44 : memref<256xf32, #tpu.memory_space<vmem>>) target_semaphore(%46 : memref<!tpu.dma_semaphore, #tpu.memory_space<semaphore_mem>>)
      %47 = arith.addi %0, %arg11 : i32
      %48 = arith.index_cast %47 : i32 to index
      %49 = memref.load %arg2[%48] : memref<8xi32, #tpu.memory_space<smem>>
      %c8_i32_26 = arith.constant 8 : i32
      %50 = arith.addi %c8_i32_26, %arg11 : i32
      %c1_i32_27 = arith.constant 1 : i32
      %c0_i32_28 = arith.constant 0 : i32
      %51 = tpu.memref_slice %arg3[%49, %c0_i32_28] : memref<64x256xf32, #tpu.memory_space<any>> -> memref<1x256xf32, #tpu.memory_space<any>>
      %52 = tpu.memref_squeeze %51 : memref<1x256xf32, #tpu.memory_space<any>> -> memref<256xf32, #tpu.memory_space<any>>
      %c0_i32_29 = arith.constant 0 : i32
      %53 = tpu.memref_slice %arg9[%50, %c0_i32_29] : memref<16x256xf32, #tpu.memory_space<vmem>> -> memref<1x256xf32, #tpu.memory_space<vmem>>
      %54 = tpu.memref_squeeze %53 : memref<1x256xf32, #tpu.memory_space<vmem>> -> memref<256xf32, #tpu.memory_space<vmem>>
      %55 = tpu.memref_slice %arg10[%c1_i32_27] : memref<2x!tpu.dma_semaphore, #tpu.memory_space<semaphore_mem>> -> memref<1x!tpu.dma_semaphore, #tpu.memory_space<semaphore_mem>>
      %56 = tpu.memref_squeeze %55 : memref<1x!tpu.dma_semaphore, #tpu.memory_space<semaphore_mem>> -> memref<!tpu.dma_semaphore, #tpu.memory_space<semaphore_mem>>
      tpu.enqueue_dma source(%52 : memref<256xf32, #tpu.memory_space<any>>) target(%54 : memref<256xf32, #tpu.memory_space<vmem>>) target_semaphore(%56 : memref<!tpu.dma_semaphore, #tpu.memory_space<semaphore_mem>>)
    }
    %c8_i32_1 = arith.constant 8 : i32
    %c0_i32_2 = arith.constant 0 : i32
    %c8_i32_3 = arith.constant 8 : i32
    %2 = arith.addi %c0_i32_2, %c8_i32_3 : i32
    %c1_i32_4 = arith.constant 1 : i32
    scf.for %arg11 = %c0_i32_2 to %2 step %c1_i32_4  : i32 {
      %c0_i32_23 = arith.constant 0 : i32
      %c0_i32_24 = arith.constant 0 : i32
      %c0_i32_25 = arith.constant 0 : i32
      %38 = tpu.memref_slice %arg3[%c0_i32_23, %c0_i32_25] : memref<64x256xf32, #tpu.memory_space<any>> -> memref<1x256xf32, #tpu.memory_space<any>>
      %39 = tpu.memref_squeeze %38 : memref<1x256xf32, #tpu.memory_space<any>> -> memref<256xf32, #tpu.memory_space<any>>
      %c0_i32_26 = arith.constant 0 : i32
      %40 = tpu.memref_slice %arg9[%arg11, %c0_i32_26] : memref<16x256xf32, #tpu.memory_space<vmem>> -> memref<1x256xf32, #tpu.memory_space<vmem>>
      %41 = tpu.memref_squeeze %40 : memref<1x256xf32, #tpu.memory_space<vmem>> -> memref<256xf32, #tpu.memory_space<vmem>>
      %42 = tpu.memref_slice %arg10[%c0_i32_24] : memref<2x!tpu.dma_semaphore, #tpu.memory_space<semaphore_mem>> -> memref<1x!tpu.dma_semaphore, #tpu.memory_space<semaphore_mem>>
      %43 = tpu.memref_squeeze %42 : memref<1x!tpu.dma_semaphore, #tpu.memory_space<semaphore_mem>> -> memref<!tpu.dma_semaphore, #tpu.memory_space<semaphore_mem>>
      tpu.wait_dma2 semaphore(%43 : memref<!tpu.dma_semaphore, #tpu.memory_space<semaphore_mem>>) src(%39 : memref<256xf32, #tpu.memory_space<any>>) dst(%41 : memref<256xf32, #tpu.memory_space<vmem>>)
      %c8_i32_27 = arith.constant 8 : i32
      %44 = arith.addi %c8_i32_27, %arg11 : i32
      %c0_i32_28 = arith.constant 0 : i32
      %c1_i32_29 = arith.constant 1 : i32
      %c0_i32_30 = arith.constant 0 : i32
      %45 = tpu.memref_slice %arg3[%c0_i32_28, %c0_i32_30] : memref<64x256xf32, #tpu.memory_space<any>> -> memref<1x256xf32, #tpu.memory_space<any>>
      %46 = tpu.memref_squeeze %45 : memref<1x256xf32, #tpu.memory_space<any>> -> memref<256xf32, #tpu.memory_space<any>>
      %c0_i32_31 = arith.constant 0 : i32
      %47 = tpu.memref_slice %arg9[%44, %c0_i32_31] : memref<16x256xf32, #tpu.memory_space<vmem>> -> memref<1x256xf32, #tpu.memory_space<vmem>>
      %48 = tpu.memref_squeeze %47 : memref<1x256xf32, #tpu.memory_space<vmem>> -> memref<256xf32, #tpu.memory_space<vmem>>
      %49 = tpu.memref_slice %arg10[%c1_i32_29] : memref<2x!tpu.dma_semaphore, #tpu.memory_space<semaphore_mem>> -> memref<1x!tpu.dma_semaphore, #tpu.memory_space<semaphore_mem>>
      %50 = tpu.memref_squeeze %49 : memref<1x!tpu.dma_semaphore, #tpu.memory_space<semaphore_mem>> -> memref<!tpu.dma_semaphore, #tpu.memory_space<semaphore_mem>>
      tpu.wait_dma2 semaphore(%50 : memref<!tpu.dma_semaphore, #tpu.memory_space<semaphore_mem>>) src(%46 : memref<256xf32, #tpu.memory_space<any>>) dst(%48 : memref<256xf32, #tpu.memory_space<vmem>>)
    }
    %c8_i32_5 = arith.constant 8 : i32
    %c0 = arith.constant 0 : index
    %c0_6 = arith.constant 0 : index
    %3 = vector.load %arg9[%c0, %c0_6] : memref<16x256xf32, #tpu.memory_space<vmem>>, vector<16x256xf32>
    %4 = arith.truncf %3 : vector<16x256xf32> to vector<16x256xbf16>
    %c0_7 = arith.constant 0 : index
    %c0_8 = arith.constant 0 : index
    %5 = vector.load %arg4[%c0_7, %c0_8] : memref<256x128xbf16, #tpu.memory_space<vmem>>, vector<256x128xbf16>
    %cst = arith.constant dense<0.000000e+00> : vector<16x128xf32>
    %6 = tpu.matmul %4, %5, %cst {dimension_numbers = #tpu.dot_dimension_numbers<[1], [0], [0], [1], [0, 0, 1, 1], [], []>} : vector<16x256xbf16>, vector<256x128xbf16>, vector<16x128xf32> -> vector<16x128xf32>
    %c0_9 = arith.constant 0 : index
    %c0_10 = arith.constant 0 : index
    %7 = vector.load %arg5[%c0_9, %c0_10] : memref<1x128xf32, #tpu.memory_space<vmem>>, vector<1x128xf32>
    %8 = vector.broadcast %7 : vector<1x128xf32> to vector<16x128xf32>
    %9 = arith.addf %6, %8 : vector<16x128xf32>
    %10 = vector.extract_strided_slice %9 {offsets = [0, 0], sizes = [8, 128], strides = [1, 1]} : vector<16x128xf32> to vector<8x128xf32>
    %11 = vector.extract_strided_slice %9 {offsets = [8, 0], sizes = [8, 128], strides = [1, 1]} : vector<16x128xf32> to vector<8x128xf32>
    %c0_11 = arith.constant 0 : index
    %c0_12 = arith.constant 0 : index
    %12 = vector.load %arg6[%c0_11, %c0_12] : memref<8x128xf32, #tpu.memory_space<vmem>>, vector<8x128xf32>
    tpu.vector_store %arg6[%c0_11, %c0_12], %10 {strides = array<i32>} : memref<8x128xf32, #tpu.memory_space<vmem>>, vector<8x128xf32>,
    %c0_13 = arith.constant 0 : index
    %c0_14 = arith.constant 0 : index
    %13 = vector.load %arg7[%c0_13, %c0_14] : memref<8x128xf32, #tpu.memory_space<vmem>>, vector<8x128xf32>
    tpu.vector_store %arg7[%c0_13, %c0_14], %11 {strides = array<i32>} : memref<8x128xf32, #tpu.memory_space<vmem>>, vector<8x128xf32>,
    %14 = tpu.iota {dimensions = array<i32: 0>} : vector<8x1xi32>
    %15 = vector.broadcast %0 : i32 to vector<8x1xi32>
    %16 = arith.addi %15, %14 : vector<8x1xi32>
    %c8_i32_15 = arith.constant 8 : i32
    %17 = vector.broadcast %c8_i32_15 : i32 to vector<8x1xi32>
    %18 = arith.cmpi slt, %16, %17 : vector<8x1xi32>
    %19 = arith.extui %18 : vector<8x1xi1> to vector<8x1xi32>
    %20 = arith.sitofp %19 : vector<8x1xi32> to vector<8x1xf32>
    %21 = vector.broadcast %20 : vector<8x1xf32> to vector<8x128xf32>
    %22 = arith.mulf %10, %21 : vector<8x128xf32>
    %23 = vector.broadcast %20 : vector<8x1xf32> to vector<8x128xf32>
    %24 = arith.mulf %11, %23 : vector<8x128xf32>
    %cst_16 = arith.constant dense<0.000000e+00> : vector<128xf32>
    %25 = vector.multi_reduction <add>, %22, %cst_16 [0] : vector<8x128xf32> to vector<128xf32>
    %26 = vector.shape_cast %25 : vector<128xf32> to vector<1x128xf32>
    %27 = arith.mulf %22, %10 : vector<8x128xf32>
    %cst_17 = arith.constant dense<0.000000e+00> : vector<128xf32>
    %28 = vector.multi_reduction <add>, %27, %cst_17 [0] : vector<8x128xf32> to vector<128xf32>
    %29 = vector.shape_cast %28 : vector<128xf32> to vector<1x128xf32>
    %cst_18 = arith.constant dense<0.000000e+00> : vector<128xf32>
    %30 = vector.multi_reduction <add>, %24, %cst_18 [0] : vector<8x128xf32> to vector<128xf32>
    %31 = vector.shape_cast %30 : vector<128xf32> to vector<1x128xf32>
    %32 = arith.mulf %24, %11 : vector<8x128xf32>
    %cst_19 = arith.constant dense<0.000000e+00> : vector<128xf32>
    %33 = vector.multi_reduction <add>, %32, %cst_19 [0] : vector<8x128xf32> to vector<128xf32>
    %34 = vector.shape_cast %33 : vector<128xf32> to vector<1x128xf32>
    %cst_20 = arith.constant 0.000000e+00 : f32
    %35 = vector.broadcast %cst_20 : f32 to vector<4x128xf32>
    %36 = tpu.concatenate %26, %29, %31, %34, %35 in 0 : vector<1x128xf32>, vector<1x128xf32>, vector<1x128xf32>, vector<1x128xf32>, vector<4x128xf32> -> vector<8x128xf32>
    %c0_21 = arith.constant 0 : index
    %c0_22 = arith.constant 0 : index
    %37 = vector.load %arg8[%c0_21, %c0_22] : memref<8x128xf32, #tpu.memory_space<vmem>>, vector<8x128xf32>
    tpu.vector_store %arg8[%c0_21, %c0_22], %36 {strides = array<i32>} : memref<8x128xf32, #tpu.memory_space<vmem>>, vector<8x128xf32>,
    return
  }
  func.func @transform_1(%arg0: i32, %arg1: memref<8xi32, #tpu.memory_space<smem>>, %arg2: memref<8xi32, #tpu.memory_space<smem>>) -> (i32, i32) {
    %c0_i32 = arith.constant 0 : i32
    %c0_i32_0 = arith.constant 0 : i32
    %c0_i32_1 = arith.constant 0 : i32
    return %c0_i32, %c0_i32_0 : i32, i32
  }
  func.func @transform_2(%arg0: i32, %arg1: memref<8xi32, #tpu.memory_space<smem>>, %arg2: memref<8xi32, #tpu.memory_space<smem>>) -> (i32, i32) {
    %c0_i32 = arith.constant 0 : i32
    %c0_i32_0 = arith.constant 0 : i32
    %c0_i32_1 = arith.constant 0 : i32
    return %c0_i32, %c0_i32_0 : i32, i32
  }
  func.func @transform_3(%arg0: i32, %arg1: memref<8xi32, #tpu.memory_space<smem>>, %arg2: memref<8xi32, #tpu.memory_space<smem>>) -> (i32, i32) {
    %c0_i32 = arith.constant 0 : i32
    %c0_i32_0 = arith.constant 0 : i32
    return %arg0, %c0_i32 : i32, i32
  }
  func.func @transform_4(%arg0: i32, %arg1: memref<8xi32, #tpu.memory_space<smem>>, %arg2: memref<8xi32, #tpu.memory_space<smem>>) -> (i32, i32) {
    %c0_i32 = arith.constant 0 : i32
    %c0_i32_0 = arith.constant 0 : i32
    return %arg0, %c0_i32 : i32, i32
  }
  func.func @transform_5(%arg0: i32, %arg1: memref<8xi32, #tpu.memory_space<smem>>, %arg2: memref<8xi32, #tpu.memory_space<smem>>) -> (i32, i32) {
    %c0_i32 = arith.constant 0 : i32
    %c0_i32_0 = arith.constant 0 : i32
    return %arg0, %c0_i32 : i32, i32
  }
}

</mosaic_0001>

<bundles_post_ra>
// kernel: tpu_custom_call.1
= control target key start
LH: loop header
LB: loop body
LE: loop exit
PB: predicated region body
PF: predicated region fallthrough
CT: control target
= control target key end

     0   :  { %s864_s0 = inlined_call_operand.hbm [shape: s32[8], index: 0, kind: input, shape index: {}]   ;;  %s865_s2 = inlined_call_operand.hbm [shape: f32[64,256], index: 2, kind: input, shape index: {}]   ;;  %s866_s3 = inlined_call_operand.hbm [shape: bf16[256,128], index: 3, kind: input, shape index: {}]   ;;  %s867_s4 = inlined_call_operand.vmem [shape: f32[1,128], index: 4, kind: input, shape index: {}]   ;;  %s868_s5 = inlined_call_operand.hbm [shape: f32[8,128], index: 5, kind: output, shape index: {0}]   ;;  %s869_s6 = inlined_call_operand.hbm [shape: f32[8,128], index: 6, kind: output, shape index: {1}]   ;;  %s870_s7 = inlined_call_operand.hbm [shape: f32[8,128], index: 7, kind: output, shape index: {2}]   ;;  %s871_s1 = inlined_call_operand.vmem [shape: s32[8], index: 1, kind: input, shape index: {}]  }
   0x1   :  { %s493_s26 = scalar_lea.hbm %s864_s0, 16 }
   0x2   :  { %p494_p0 = scmp.ne.s32.totalorder %s864_s0, %s493_s26  ;;  %p497_p1 = scmp.lt.u32.totalorder %s493_s26, %s864_s0 }
   0x4   :  { %p499_p2 = pnand %p497_p1, %p494_p0 }
   0x6   :  { %502 = shalt.err (!%p499_p2)  }
   0x7   :  { %s679_s8 = smov [#allocation5]   ;;  %s15_s13 = sshll.u32 %s871_s1, 4  ;;  %s16_s13 = int_to_ptr.vmem [resolvable:$true] %s15_s13 }
   0x8   :  { %14 = dma.hbm_to_smem %s864_s0, 16, %s679_s8, [#allocation4] }
   0x9   :  { %s503_s14 = scalar_lea.vmem %s16_s13, 16  ;;  %p508_p4 = scmp.lt.s32.totalorder %s16_s13, %s16_s13 }
   0xa   :  { %p504_p3 = scmp.ne.s32.totalorder %s16_s13, %s503_s14  ;;  %p509_p5 = scmp.lt.s32.totalorder %s503_s14, %s503_s14 }
   0xc   :  { %p510_p6 = por %p509_p5, %p508_p4 }
   0xe   :  { %p511_p7 = pnand %p510_p6, %p504_p3 }
  0x10   :  { %514 = shalt.err (!%p511_p7)  }
  0x11   :  { %s680_s15 = smov [#allocation6]  }
  0x12   :  { %18 = dma.vmem_to_smem %s16_s13, 16, %s680_s15, [#allocation4] }
  0x13   :  { %659 = dma.done.wait [#allocation4], 32 }
  0x14   :  { %660 = vsyncadd [#allocation4], 4294967264 }
  0x15   :  { %20 = sfence }
  0x16   :  { %21 = vsyncpa [#allocation8], 0 }
  0x17   :  { %22 = vsyncpa [#allocation9], 0 }
  0x18   :  { %23 = vsyncpa [#allocation12], 0  ;;  %s681_s0 = smov [#allocation7]   ;;  %s515_s18 = scalar_lea.hbm %s866_s3, 2048 }
  0x19   :  { %s29_s16 = sshll.u32 %s681_s0, 4  ;;  %p516_p8 = scmp.ne.s32.totalorder %s866_s3, %s515_s18  ;;  %s30_s16 = int_to_ptr.vmem [resolvable:$true] %s29_s16 }
  0x1a   :  { %p519_p9 = scmp.lt.u32.totalorder %s515_s18, %s866_s3 }
  0x1c   :  { %p521_p10 = pnand %p519_p9, %p516_p8 }
  0x1e   :  { %524 = shalt.err (!%p521_p10)
}
  0x1f   :  { %s525_s23 = scalar_lea.vmem %s30_s16, 2048  ;;  %p530_p12 = scmp.lt.s32.totalorder %s30_s16, %s30_s16 }
  0x20   :  { %p526_p11 = scmp.ne.s32.totalorder %s30_s16, %s525_s23  ;;  %p531_p13 = scmp.lt.s32.totalorder %s525_s23, %s525_s23 }
  0x22   :  { %p532_p0 = por %p531_p13, %p530_p12 }
  0x24   :  { %p533_p1 = pnand %p532_p0, %p526_p11 }
  0x26   :  { %536 = shalt.err (!%p533_p1)
}
  0x27   :  { %s682_s24 = smov 64   ;;  %s683_s25 = smov 4  }
  0x28   :  { %35 = dma.hbm_to_vmem [thread:$0]  %s866_s3, 2048, %s30_s16, [#allocation8], %s682_s24, %s682_s24, %s683_s25  }
  0x29   :  { %661 = dma.done.wait [#allocation8], 2048  }
  0x2a   :  { %662 = vsyncadd [#allocation8], 4294965248  ;;  %s757_s28 = smov 0  }
  0x2b LB: > { %s50_s29 = sld [smem:[#allocation5 + %s673_s28]]  ;;  %s57_s30 = sshrl.u32 %s673_s28, 3  ;;  %s673_s28 = sphi %s757_s28, %s48_s28  }
  0x2c   : > { %s58_s8 = sand.u32 7, %s673_s28   ;;  %s406_s9 = sshll.u32 %s57_s30, 4 }
  0x2d   : > { %s60_s10 = sadd.s32 %s406_s9, %s58_s8  ;;  %s766_s3 = sld [smem:[#allocation6 + %s673_s28]] }
  0x2e   : > { %s68_s11 = sadd.s32 8, %s673_s28  ;;  %s61_s12 = scalar_lea.vmem [#allocation2], %s60_s10 }
  0x2f   : > { %s63_s13 = sshll.u32 %s61_s12, 4  ;;  %s769_s14 = sshrl.u32 %s68_s11, 3  ;;  %s771_s13 = int_to_ptr.vmem [resolvable:$true] %s63_s13 }
  0x30   : > { %s773_s15 = sand.u32 7, %s68_s11   ;;  %s409_s17 = sshll.u32 %s769_s14, 4 }
  0x31   : > { %s51_s0 = sshrl.u32 %s50_s29, 3  ;;  %s52_s16 = sand.u32 7, %s50_s29  }
  0x32   : > { %s404_s1 = sshll.u32 %s51_s0, 4  ;;  %s539_s8 = scalar_lea.hbm %s865_s2, 2048 }
  0x33   : > { %s54_s18 = sadd.s32 %s404_s1, %s52_s16  ;;  %s69_s19 = sshrl.u32 %s766_s3, 3 }
  0x34   : > { %s405_s20 = sshll.u32 %s54_s18, 4  ;;  %s70_s21 = sand.u32 7, %s766_s3  }
  0x35   : > { %s56_s24 = scalar_lea.hbm %s865_s2, %s405_s20  ;;  %s407_s25 = sshll.u32 %s69_s19, 4 }
  0x36   : > { %s537_s26 = scalar_lea.hbm %s56_s24, 32  ;;  %p540_p3 = scmp.lt.u32.totalorder %s56_s24, %s865_s2 }
  0x37   : > { %p538_p2 = scmp.ne.s32.totalorder %s56_s24, %s537_s26  ;;  %p541_p4 = scmp.lt.u32.totalorder %s539_s8, %s537_s26 }
  0x38   : > { %p543_p6 = scmp.lt.u32.totalorder %s537_s26, %s56_s24 }
  0x39   : > { %p542_p5 = por %p541_p4, %p540_p3 }
  0x3b   : > { %p544_p7 = por %p543_p6, %p542_p5 }
  0x3d   : > { %p545_p8 = pnand %p544_p7, %p538_p2 }
  0x3f   : > { %548 = shalt.err (!%p545_p8)  }
  0x40   : > { %s549_s12 = scalar_lea.vmem %s771_s13, 32  ;;  %s684_s0 = smov [#allocation2]  }
  0x41   : > { %p550_p9 = scmp.ne.s32.totalorder %s771_s13, %s549_s12  ;;  %s551_s16 = sshll.u32 %s684_s0, 4  ;;  %s793_s16 = int_to_ptr.vmem [resolvable:$false] %s551_s16 }
  0x42   : > { %s553_s1 = scalar_lea.vmem %s793_s16, 512  ;;  %p554_p10 = scmp.lt.s32.totalorder %s771_s13, %s793_s16 }
  0x43   : > { %p555_p11 = scmp.lt.s32.totalorder %s553_s1, %s549_s12 }
  0x45   : > { %p556_p12 = por %p555_p11, %p554_p10 }
  0x47   : > { %p557_p13 = pnand %p556_p12, %p550_p9 }
  0x49   : > { %560 = shalt.err (!%p557_p13)  }
  0x4a   : > { %s685_s18 = smov 128   ;;  %s686_s19 = smov 1  }
  0x4b   : > { %66 = dma.hbm_to_vmem [thread:$0]  %s56_s24, 32, %s771_s13, [#allocation3], %s685_s18, %s685_s18, %s686_s19 }
  0x4c   : > { %s72_s20 = sadd.s32 %s407_s25, %s70_s21  ;;  %s78_s22 = sadd.s32 %s409_s17, %s773_s15 }
  0x4d   : > { %s408_s23 = sshll.u32 %s72_s20, 4  ;;  %s79_s9 = scalar_lea.vmem [#allocation2], %s78_s22 }
  0x4e   : > { %s74_s30 = scalar_lea.hbm %s865_s2, %s408_s23  ;;  %s82_s10 = sshll.u32 %s79_s9, 4  ;;  %s83_s10 = int_to_ptr.vmem [resolvable:$true] %s82_s10 }
  0x4f   : > { %s561_s29 = scalar_lea.hbm %s74_s30, 32  ;;  %p564_p1 = scmp.lt.u32.totalorder %s74_s30, %s865_s2 }
  0x50   : > { %p562_p0 = scmp.ne.s32.totalorder %s74_s30, %s561_s29  ;;  %p565_p2 = scmp.lt.u32.totalorder %s539_s8, %s561_s29 }
  0x51   : > { %p567_p4 = scmp.lt.u32.totalorder %s561_s29, %s74_s30 }
  0x52   : > { %p566_p3 = por %p565_p2, %p564_p1 }
  0x54   : > { %p568_p5 = por %p567_p4, %p566_p3 }
  0x56   : > { %p569_p6 = pnand %p568_p5, %p562_p0 }
  0x58   : > { %572 = shalt.err (!%p569_p6)  }
  0x59   : > { %s573_s3 = scalar_lea.vmem %s83_s10, 32  ;;  %p578_p8 = scmp.lt.s32.totalorder %s83_s10, %s793_s16 }
  0x5a   : > { %p574_p7 = scmp.ne.s32.totalorder %s83_s10, %s573_s3  ;;  %p579_p9 = scmp.lt.s32.totalorder %s553_s1, %s573_s3 }
  0x5c   : > { %p580_p10 = por %p579_p9, %p578_p8 }
  0x5e   : > { %p581_p11 = pnand %p580_p10, %p574_p7 }
  0x60   : > { %584 = shalt.err (!%p581_p11)  }
  0x61   : > { %85 = dma.hbm_to_vmem [thread:$0]  %s74_s30, 32, %s83_s10, [#allocation3 + $0x1], %s685_s18, %s685_s18, %s686_s19 }
  0x62   : > { %s48_s28 = sadd.s32 1, %s673_s28  }
  0x63   : > { %p45_p12 = scmp.ge.s32.totalorder %s48_s28, 8  }
  0x64   :  { %s675_s14 = smov (%p45_p12), 0  }
  0x65   :  { %47 = sbr.rel (!%p45_p12) target bundleno = 43 (0x2b), region = 69 }
  0x6c LB: > { %663 = dma.done.wait [#allocation3], 32  ;;  %s677_s14 = sphi %s675_s14, %s91_s14  }
  0x6d   : > { %664 = vsyncadd [#allocation3], 4294967264 }
  0x6e   : > { %665 = dma.done.wait [#allocation3 + $0x1], 32 }
  0x6f   : > { %666 = vsyncadd [#allocation3 + $0x1], 4294967264  ;;  %s91_s14 = sadd.s32 1, %s677_s14  }
  0x70   : > { %p88_p13 = scmp.ge.s32.totalorder %s91_s14, 8  }
  0x71   :  { %v477_v0 = vld [vmem:[#allocation7 + $0x40] sm:$0xff] (%p88_p13)   ;;  %v479_v2 = vld [vmem:[#allocation7 + $0x48] sm:$0xff] (%p88_p13)   ;;  %v481_v4 = vld [vmem:[#allocation7 + $0x50] sm:$0xff] (%p88_p13)   ;;  %s687_s15 = smov (%p88_p13), [#allocation10]   ;;  %s688_s21 = smov (%p88_p13), [#allocation11]  }
  0x72   :  { %90 = sbr.rel (!%p88_p13) target bundleno = 108 (0x6c), region = 80  ;;  %v478_v1 = vld [vmem:[#allocation7] sm:$0xff] (%p88_p13)   ;;  %429 = vmatprep.subr.bf16.mxu0 (%p88_p13), %v477_v0  ;;  %v480_v3 = vld [vmem:[#allocation7 + $0x8] sm:$0xff] (%p88_p13)   ;;  %v482_v5 = vld [vmem:[#allocation7 + $0x10] sm:$0xff] (%p88_p13)   ;;  %s331_s17 = sshll.u32 (%p88_p13), %s687_s15, 4  ;;  %s332_s17 = int_to_ptr.vmem [resolvable:$true] %s331_s17 }
  0x73   :  { %430 = vmatpush3.bf16.msra.mxu0 (%p88_p13), %v478_v1  ;;  %v483_v6 = vld [vmem:[#allocation7 + $0x58] sm:$0xff] (%p88_p13)   ;;  %v485_v8 = vld [vmem:[#allocation7 + $0x60] sm:$0xff] (%p88_p13)   ;;  %v487_v10 = vld [vmem:[#allocation7 + $0x68] sm:$0xff] (%p88_p13)   ;;  %s341_s24 = sshll.u32 (%p88_p13), %s688_s21, 4  ;;  %s585_s25 = scalar_lea.vmem (%p88_p13), %s332_s17, 128  ;;  %s821_s24 = int_to_ptr.vmem [resolvable:$true] %s341_s24 }
  0x74   :  { %431 = vmatprep.subr.bf16.mxu0 (%p88_p13), %v479_v2  ;;  %v484_v7 = vld [vmem:[#allocation7 + $0x18] sm:$0xff] (%p88_p13)   ;;  %v486_v9 = vld [vmem:[#allocation7 + $0x20] sm:$0xff] (%p88_p13)   ;;  %v98_v11 = vld [vmem:[#allocation2 + $0x8] sm:$0xff] (%p88_p13)  ;;  %p586_p0 = scmp.ne.s32.totalorder (%p88_p13), %s332_s17, %s585_s25  ;;  %p590_p1 = scmp.lt.s32.totalorder (%p88_p13), %s332_s17, %s332_s17 }
  0x75   :  { %v100_v12 = vld [vmem:[#allocation2 + $0x18] sm:$0xff] (%p88_p13)  ;;  %v488_v14 = vld [vmem:[#allocation7 + $0x28] sm:$0xff] (%p88_p13)   ;;  %v489_v15 = vld [vmem:[#allocation7 + $0x70] sm:$0xff] (%p88_p13)   ;;  %p591_p2 = scmp.lt.s32.totalorder (%p88_p13), %s585_s25, %s585_s25 }
  0x76   :  { %v102_v13 = vpack.c.bf16 (%p88_p13), %v100_v12, %v98_v11  ;;  %v490_v16 = vld [vmem:[#allocation7 + $0x30] sm:$0xff] (%p88_p13)   ;;  %v491_v17 = vld [vmem:[#allocation7 + $0x78] sm:$0xff] (%p88_p13)   ;;  %v97_v19 = vld [vmem:[#allocation2] sm:$0xff] (%p88_p13) }
  0x77   :  { %432 = vmatpush3.bf16.msra.mxu0 (%p88_p13), %v480_v3  ;;  %v492_v18 = vld [vmem:[#allocation7 + $0x38] sm:$0xff] (%p88_p13)   ;;  %v99_v20 = vld [vmem:[#allocation2 + $0x10] sm:$0xff] (%p88_p13)  ;;  %v410_v23 = vld [vmem:[%s867_s4] ss:$0 sm:$0xff] (%p88_p13)  ;;  %p592_p3 = por (%p88_p13), %p591_p2, %p590_p1 }
  0x78   :  { %433 = vmatprep.subr.bf16.mxu0 (%p88_p13), %v481_v4  ;;  %270 = vmatprep.mubr.bf16.mxu0 (%p88_p13), %v102_v13  ;;  %v101_v21 = vpack.c.bf16 (%p88_p13), %v99_v20, %v97_v19 }
  0x79   :  { %p593_p4 = pnand %p592_p3, %p586_p0 }
  0x7b   :  { %434 = vmatpush3.bf16.msra.mxu0 %v482_v5 }
  0x7c   :  { %435 = vmatprep.subr.bf16.mxu0 %v483_v6 }
  0x7f   :  { %436 = vmatpush3.bf16.msra.mxu0 %v484_v7 }
  0x80   :  { %437 = vmatprep.subr.bf16.mxu0 %v485_v8 }
  0x83   :  { %438 = vmatpush3.bf16.msra.mxu0 %v486_v9 }
  0x84   :  { %439 = vmatprep.subr.bf16.mxu0 %v487_v10 }
  0x87   :  { %440 = vmatpush3.bf16.msra.mxu0 %v488_v14 }
  0x88   :  { %441 = vmatprep.subr.bf16.mxu0 %v489_v15 }
  0x8b   :  { %442 = vmatpush3.bf16.msra.mxu0 %v490_v16 }
  0x8c   :  { %443 = vmatprep.subr.bf16.mxu0 %v491_v17 }
  0x8f   :  { %444 = vmatpush3.bf16.msra.mxu0 %v492_v18 }
  0x92   :  { %271 = vmatmul.mubr.bf16.vlgmr.msra.gmra.mrb[0].mxu0 %v101_v21 }
 0x165   :  { %v445_v22 = vpop.f32.mrb[0].mxu0 }
 0x166   :  { %v446_v24 = vpop.f32.mrb[1].mxu0 }
 0x167   :  { %v447_v25 = vadd.f32 %v446_v24, %v445_v22  ;;  %v448_v26 = vpop.f32.mrb[2].mxu0 }
 0x168   :  { %v449_v27 = vpop.f32.mrb[3].mxu0 }
 0x169   :  { %v273_v28 = vadd.f32 %v447_v25, %v410_v23  ;;  %v450_v29 = vadd.f32 %v449_v27, %v448_v26 }
 0x16b   :  { %v290_v30 = vrot.slane %v273_v28, 4  ;;  %v296_v31 = vmul.f32 %v273_v28, %v273_v28  ;;  %279 = vst [vmem:[#allocation10] sm:$0xff] %v273_v28  ;;  %v276_v32 = vadd.f32 %v450_v29, %v410_v23 }
 0x16c   :  { %596 = shalt.err (!%p593_p4)
}
 0x16d   :  { %s597_s16 = scalar_lea.hbm %s868_s5, 128 }
 0x16e   :  { %p598_p5 = scmp.ne.s32.totalorder %s868_s5, %s597_s16  ;;  %p601_p6 = scmp.lt.u32.totalorder %s597_s16, %s868_s5 }
 0x170   :  { %p603_p7 = pnand %p601_p6, %p598_p5 }
 0x172   :  { %606 = shalt.err (!%p603_p7)
}
 0x173   :  { %334 = dma.vmem_to_hbm [thread:$0]  %s332_s17, 128, %s868_s5, [#allocation9]   ;;  %v291_v33 = vadd.f32 %v290_v30, %v273_v28  ;;  %v297_v34 = vrot.slane %v296_v31, 4  ;;  %v303_v35 = vrot.slane %v276_v32, 4  ;;  %v309_v36 = vmul.f32 %v276_v32, %v276_v32  ;;  %280 = vst [vmem:[#allocation11] sm:$0xff] %v276_v32 }
 0x174   :  { %s607_s26 = scalar_lea.vmem %s821_s24, 128  ;;  %p612_p9 = scmp.lt.s32.totalorder %s821_s24, %s821_s24 }
 0x175   :  { %p608_p8 = scmp.ne.s32.totalorder %s821_s24, %s607_s26  ;;  %p613_p10 = scmp.lt.s32.totalorder %s607_s26, %s607_s26 }
 0x177   :  { %p614_p11 = por %p613_p10, %p612_p9 }
 0x179   :  { %p615_p12 = pnand %p614_p11, %p608_p8 }
 0x17b   :  { %618 = shalt.err (!%p615_p12)
}
 0x17c   :  { %s619_s9 = scalar_lea.hbm %s869_s6, 128 }
 0x17d   :  { %p620_p13 = scmp.ne.s32.totalorder %s869_s6, %s619_s9  ;;  %p623_p0 = scmp.lt.u32.totalorder %s619_s9, %s869_s6 }
 0x17f   :  { %p625_p1 = pnand %p623_p0, %p620_p13 }
 0x181   :  { %628 = shalt.err (!%p625_p1)
}
 0x182   :  { %344 = dma.vmem_to_hbm [thread:$0]  %s821_s24, 128, %s869_s6, [#allocation12]   ;;  %v292_v37 = vrot.slane %v291_v33, 2  ;;  %v298_v38 = vadd.f32 %v297_v34, %v296_v31  ;;  %v304_v39 = vadd.f32 %v303_v35, %v276_v32  ;;  %v310_v40 = vrot.slane %v309_v36, 4 }
 0x183   :  { %vm316_vm0 = vcmask 1040384   ;;  %vm318_vm1 = vcmask 1041408   ;;  %vm320_vm2 = vcmask 1042432   ;;  %s689_s6 = smov [#allocation13]   ;;  %vm322_vm3 = vcmask 1043456  }
 0x184   :  { %v293_v41 = vadd.f32 %v292_v37, %v291_v33  ;;  %v299_v42 = vrot.slane %v298_v38, 2  ;;  %v305_v43 = vrot.slane %v304_v39, 2  ;;  %v311_v44 = vadd.f32 %v310_v40, %v309_v36  ;;  %s351_s13 = sshll.u32 %s689_s6, 4  ;;  %s352_s13 = int_to_ptr.vmem [resolvable:$true] %s351_s13 }
 0x185   :  { %s629_s3 = scalar_lea.vmem %s352_s13, 128  ;;  %p634_p3 = scmp.lt.s32.totalorder %s352_s13, %s352_s13 }
 0x186   :  { %v294_v45 = vrot.slane %v293_v41, 1  ;;  %v300_v46 = vadd.f32 %v299_v42, %v298_v38  ;;  %v306_v47 = vadd.f32 %v305_v43, %v304_v39  ;;  %v312_v48 = vrot.slane %v311_v44, 2  ;;  %p630_p2 = scmp.ne.s32.totalorder %s352_s13, %s629_s3  ;;  %p635_p4 = scmp.lt.s32.totalorder %s629_s3, %s629_s3 }
 0x188   :  { %v301_v49 = vrot.slane %v300_v46, 1  ;;  %v307_v50 = vrot.slane %v306_v47, 1  ;;  %v313_v51 = vadd.f32 %v312_v48, %v311_v44  ;;  %v295_v52 = vadd.f32 %v294_v45, %v293_v41  ;;  %p636_p5 = por %p635_p4, %p634_p3 }
 0x18a   :  { %v302_v53 = vadd.f32 %v301_v49, %v300_v46  ;;  %v308_v54 = vadd.f32 %v307_v50, %v306_v47  ;;  %v314_v55 = vrot.slane %v313_v51, 1  ;;  %p637_p6 = pnand %p636_p5, %p630_p2 }
 0x18c   :  { %v315_v56 = vadd.f32 %v314_v55, %v313_v51  ;;  %v317_v57 = vsel %vm316_vm0, %v295_v52, %v302_v53 }
 0x18d   :  { %v319_v58 = vsel %vm318_vm1, %v317_v57, %v308_v54 }
 0x18e   :  { %v321_v59 = vsel %vm320_vm2, %v319_v58, %v315_v56 }
 0x18f   :  { %v323_v60 = vsel %vm322_vm3, %v321_v59, 0.0 }
 0x190   :  { %324 = vst [vmem:[#allocation13] sm:$0xff] %v323_v60 }
 0x191   :  { %640 = shalt.err (!%p637_p6)
}
 0x192   :  { %s641_s28 = scalar_lea.hbm %s870_s7, 128 }
 0x193   :  { %p642_p7 = scmp.ne.s32.totalorder %s870_s7, %s641_s28  ;;  %p645_p8 = scmp.lt.u32.totalorder %s641_s28, %s870_s7 }
 0x195   :  { %p647_p9 = pnand %p645_p8, %p642_p7 }
 0x197   :  { %650 = shalt.err (!%p647_p9)
}
 0x198   :  { %354 = dma.vmem_to_hbm [thread:$0]  %s352_s13, 128, %s870_s7, [#allocation12]  }
 0x199   :  { %667 = dma.done.wait [#allocation9], 128  }
 0x19a   :  { %668 = vsyncadd [#allocation9], 4294967168 }
 0x19b   :  { %669 = dma.done.wait [#allocation12], 256  }
 0x19c   :  { %670 = vsyncadd [#allocation12], 4294967040 }
 0x19d   :  { %364 = vsyncpa [#allocation8], 1 }
 0x19e   :  { %365 = vsyncpa [#allocation9], 1 }
 0x19f   :  { %366 = vsyncpa [#allocation12], 1 }
 0x1a0   :  { %367 = vsyncmov [#allocation3] }
 0x1a3   :  { %s368_s8 = vpop.sfrf %367 }
 0x1a4   :  { %p427_p10 = scmp.ne.s32.totalorder %s368_s8, 0 }
 0x1a6   :  { %372 = shalt.err (%p427_p10)  }
 0x1a7   :  { %374 = vsyncmov [#allocation3 + $0x1] }
 0x1aa   :  { %s375_s16 = vpop.sfrf %374 }
 0x1ab   :  { %p428_p11 = scmp.ne.s32.totalorder %s375_s16, 0 }
 0x1ad   :  { %379 = shalt.err (%p428_p11)  }

</bundles_post_ra>
